<compile_context>
chip_gen: v5e
topology: v5e:2x2
jax: 0.10.0
libtpu: 0.0.40
codegen_flags: <defaults>
</compile_context>

<pallas_src>
import math
import functools

import jax
import jax.numpy as jnp
from jax.experimental import pallas as pl
from jax.experimental.pallas import tpu as pltpu


_GELU_C = math.sqrt(2.0 / math.pi)


def _detect_vmem_cap():
    try:
        info = pltpu.get_tpu_info()
        cap = int(getattr(info, "vmem_capacity_bytes", 0) or 0)
        if cap > 0:
            return cap
    except Exception:
        pass
    return 64 * 1024 * 1024          # conservative fallback (v7x-sized)


_VMEM_CAP = _detect_vmem_cap()
# Leave headroom for Mosaic internal scratch and double buffers.
_VMEM_LIMIT = min(int(_VMEM_CAP * 0.85), 110 * 1024 * 1024)
_BIG_VMEM = _VMEM_CAP >= 100 * 1024 * 1024   # v5e / v6e (128 MiB); v7x is 64 MiB


def _compiler_params(dims):
    return pltpu.CompilerParams(dimension_semantics=dims,
                                vmem_limit_bytes=_VMEM_LIMIT)


# ----------------------------- in-kernel helpers -----------------------------

def _layernorm(x, g, b, eps=1e-5):
    mu = jnp.mean(x, axis=-1, keepdims=True)
    var = jnp.mean((x - mu) ** 2, axis=-1, keepdims=True)
    return (x - mu) * jax.lax.rsqrt(var + eps) * g + b


def _gelu_tanh(x):
    return 0.5 * x * (1.0 + jnp.tanh(_GELU_C * (x + 0.044715 * x * x * x)))


# ----------------------------- QKV projection kernel (ln1(x) @ Wqkv + b) -----------------------------

def _qkv_kernel(x_ref, ln_ref, wqkv_ref, b_ref, q_ref, k_ref, v_ref):
    x = x_ref[0]                                    # (TQ, C) f32
    C = x.shape[-1]
    ln = ln_ref[...]                                # (2, C)
    h = _layernorm(x, ln[0:1, :], ln[1:2, :]).astype(jnp.bfloat16)
    qkv = (jnp.dot(h, wqkv_ref[...], preferred_element_type=jnp.float32)
           + b_ref[...]).astype(jnp.bfloat16)       # single bf16 cast after bias add
    q_ref[0] = qkv[:, :C]                           # lane-dense (C multiple of 128) stores
    k_ref[0] = qkv[:, C:2 * C]
    v_ref[0] = qkv[:, 2 * C:]


def run_qkv(x, blk, tq):
    B, T, C = x.shape
    sd = jax.ShapeDtypeStruct((B, T, C), jnp.bfloat16)
    io_spec = pl.BlockSpec((1, tq, C), lambda b, t: (b, t, 0))
    return pl.pallas_call(
        _qkv_kernel,
        out_shape=(sd, sd, sd),
        grid=(B, pl.cdiv(T, tq)),
        in_specs=[io_spec,
                  pl.BlockSpec(blk['ln_attn'].shape, lambda b, t: (0, 0)),
                  pl.BlockSpec(blk['w_qkv_t'].shape, lambda b, t: (0, 0)),
                  pl.BlockSpec(blk['b_qkv'].shape, lambda b, t: (0, 0))],
        out_specs=(io_spec, io_spec, io_spec),
        compiler_params=_compiler_params(("parallel", "parallel")),
    )(x, blk['ln_attn'], blk['w_qkv_t'], blk['b_qkv'])


# ----------------------------- flash attention kernel (+ output proj + residual) -----------------------------

def _flash_attn_kernel(x_ref, q_ref, k_ref, v_ref, wproj_ref, bproj_ref, o_ref,
                       m_sc, l_sc, acc_sc, *, n_head, tq, tk):
    qi = pl.program_id(1)
    ki = pl.program_id(2)
    C = q_ref.shape[-1]
    D = C // n_head
    scale = 1.0 / math.sqrt(D)

    @pl.when(ki == 0)
    def _():
        m_sc[...] = jnp.full_like(m_sc, -1e30)
        l_sc[...] = jnp.zeros_like(l_sc)
        acc_sc[...] = jnp.zeros_like(acc_sc)

    # Causal block skipping: the kv block contributes iff its first column is <= the
    # last row of the q block. Skipping halves exp (EUP) and QK/PV (MXU) work.
    @pl.when(ki * tk <= qi * tq + (tq - 1))
    def _():
        q = q_ref[0].reshape(tq, n_head, D)          # bf16
        k = k_ref[0].reshape(tk, n_head, D)
        v = v_ref[0].reshape(tk, n_head, D)
        s = jnp.einsum('qhd,khd->hqk', q, k,
                       preferred_element_type=jnp.float32) * scale   # (H, TQ, TK) f32
        row = qi * tq + jax.lax.broadcasted_iota(jnp.int32, (tq, tk), 0)
        col = ki * tk + jax.lax.broadcasted_iota(jnp.int32, (tq, tk), 1)
        s = jnp.where((col <= row)[None, :, :], s, -1e30)            # finite mask value

        m_prev = m_sc[...]                                           # (H, TQ, 1)
        m_new = jnp.maximum(m_prev, jnp.max(s, axis=-1, keepdims=True))
        alpha = jnp.exp(m_prev - m_new)
        p = jnp.exp(s - m_new)                                       # (H, TQ, TK)
        l_sc[...] = alpha * l_sc[...] + jnp.sum(p, axis=-1, keepdims=True)
        acc_sc[...] = alpha * acc_sc[...] + jnp.einsum(
            'hqk,khd->hqd', p.astype(jnp.bfloat16), v,
            preferred_element_type=jnp.float32)                      # (H, TQ, D)
        m_sc[...] = m_new

    @pl.when(ki == pl.num_programs(2) - 1)
    def _():
        inv_l = pl.reciprocal(l_sc[...], approx=True)                # EUP slot
        o = acc_sc[...] * inv_l                                      # (H, TQ, D) f32
        o = jnp.transpose(o, (1, 0, 2)).reshape(tq, C)               # (TQ, C)
        y = jnp.dot(o.astype(jnp.bfloat16), wproj_ref[...],
                    preferred_element_type=jnp.float32) + bproj_ref[...]
        o_ref[0] = x_ref[0] + y                                      # fused residual add


def run_flash_attn(x, q, k, v, blk, n_head, tq, tk):
    B, T, C = x.shape
    D = C // n_head
    return pl.pallas_call(
        functools.partial(_flash_attn_kernel, n_head=n_head, tq=tq, tk=tk),
        out_shape=jax.ShapeDtypeStruct((B, T, C), jnp.float32),
        grid=(B, pl.cdiv(T, tq), pl.cdiv(T, tk)),
        in_specs=[pl.BlockSpec((1, tq, C), lambda b, i, j: (b, i, 0)),   # residual x
                  pl.BlockSpec((1, tq, C), lambda b, i, j: (b, i, 0)),   # q
                  pl.BlockSpec((1, tk, C), lambda b, i, j: (b, j, 0)),   # k
                  pl.BlockSpec((1, tk, C), lambda b, i, j: (b, j, 0)),   # v
                  pl.BlockSpec(blk['w_attn_proj_t'].shape, lambda b, i, j: (0, 0)),
                  pl.BlockSpec(blk['b_attn_proj'].shape, lambda b, i, j: (0, 0))],
        out_specs=pl.BlockSpec((1, tq, C), lambda b, i, j: (b, i, 0)),
        scratch_shapes=[pltpu.VMEM((n_head, tq, 1), jnp.float32),   # running max
                        pltpu.VMEM((n_head, tq, 1), jnp.float32),   # running denom
                        pltpu.VMEM((n_head, tq, D), jnp.float32)],  # running PV acc
        compiler_params=_compiler_params(("parallel", "parallel", "arbitrary")),
    )(x, q, k, v, blk['w_attn_proj_t'], blk['b_attn_proj'])


# ----------------------------- MLP kernel (x + mlp(ln2(x))), tiled over T -----------------------------

def _mlp_kernel(x_ref, ln_ref, wfc_ref, wproj_ref, b_ref, o_ref):
    x = x_ref[0]                                   # (TQ, C) f32
    C = x.shape[-1]
    ln = ln_ref[...]                               # (2, C)
    b = b_ref[...]                                 # (1, 5C): [b_fc | b_proj]
    b_fc = b[:, :4 * C]
    b_proj = b[:, 4 * C:]

    h = _layernorm(x, ln[0:1, :], ln[1:2, :]).astype(jnp.bfloat16)
    h = jnp.dot(h, wfc_ref[...], preferred_element_type=jnp.float32) + b_fc
    h = _gelu_tanh(h)
    h = jnp.dot(h.astype(jnp.bfloat16), wproj_ref[...],
                preferred_element_type=jnp.float32) + b_proj
    o_ref[0] = x + h


def run_mlp(x, blk, tq):
    B, T, C = x.shape
    io_spec = pl.BlockSpec((1, tq, C), lambda b, t: (b, t, 0))
    return pl.pallas_call(
        _mlp_kernel,
        out_shape=jax.ShapeDtypeStruct((B, T, C), jnp.float32),
        grid=(B, pl.cdiv(T, tq)),
        in_specs=[io_spec,
                  pl.BlockSpec(blk['ln_mlp'].shape, lambda b, t: (0, 0)),
                  pl.BlockSpec(blk['w_fc_t'].shape, lambda b, t: (0, 0)),
                  pl.BlockSpec(blk['w_mlp_proj_t'].shape, lambda b, t: (0, 0)),
                  pl.BlockSpec(blk['b_mlp'].shape, lambda b, t: (0, 0))],
        out_specs=io_spec,
        compiler_params=_compiler_params(("parallel", "parallel")),
    )(x, blk['ln_mlp'], blk['w_fc_t'], blk['w_mlp_proj_t'], blk['b_mlp'])


# ----------------------------- final LN + lm_head kernel, tiled over T and V -----------------------------

def _head_kernel(x_ref, ln_ref, wte_t_ref, o_ref):
    x = x_ref[0]                                   # (TQ, C) f32
    ln = ln_ref[...]
    h = _layernorm(x, ln[0:1, :], ln[1:2, :]).astype(jnp.bfloat16)
    o_ref[0] = jnp.dot(h, wte_t_ref[...],          # (TQ, TV) f32, lane-dense
                       preferred_element_type=jnp.float32)


def run_head(x, ln_f, wte_t):
    B, T, C = x.shape
    V = wte_t.shape[1]
    TQ = min(T, 512 if _BIG_VMEM else 256)
    TV = min(V, 4096 if _BIG_VMEM else 2048)
    return pl.pallas_call(
        _head_kernel,
        out_shape=jax.ShapeDtypeStruct((B, T, V), jnp.float32),
        grid=(B, pl.cdiv(T, TQ), pl.cdiv(V, TV)),
        in_specs=[pl.BlockSpec((1, TQ, C), lambda b, t, v: (b, t, 0)),
                  pl.BlockSpec(ln_f.shape, lambda b, t, v: (0, 0)),
                  pl.BlockSpec((C, TV), lambda b, t, v: (0, v))],
        out_specs=pl.BlockSpec((1, TQ, TV), lambda b, t, v: (b, t, v)),
        compiler_params=_compiler_params(("parallel", "parallel", "parallel")),
    )(x, ln_f, wte_t)


# ----------------------------- parameters / forward -----------------------------

def init_params(key, vocab_size, block_size, n_layer, n_head, n_embd):
    C = n_embd
    std = 0.02
    proj_std = 0.02 * (2 * n_layer) ** -0.5
    keys = iter(jax.random.split(key, 2 + 4 * n_layer))
    nk = lambda: next(keys)

    wte = (jax.random.normal(nk(), (vocab_size, C)) * std).astype(jnp.float32)
    params = {
        'wte': wte,                                            # (V, C) f32 for the embedding gather
        'wte_t': wte.T.astype(jnp.bfloat16),                   # (C, V) bf16, tied lm_head weight
        'wpe': (jax.random.normal(nk(), (block_size, C)) * std).astype(jnp.float32),
        'ln_f': jnp.concatenate([jnp.ones((1, C), jnp.float32),
                                 jnp.zeros((1, C), jnp.float32)], axis=0),
        'blocks': [],
    }
    for _ in range(n_layer):
        blk = {
            'ln_attn': jnp.concatenate([jnp.ones((1, C), jnp.float32),
                                        jnp.zeros((1, C), jnp.float32)], axis=0),
            # pre-transposed (in, out) bf16 weights
            'w_qkv_t': (jax.random.normal(nk(), (C, 3 * C)) * std).astype(jnp.bfloat16),
            'b_qkv': jnp.zeros((1, 3 * C), jnp.float32),
            'w_attn_proj_t': (jax.random.normal(nk(), (C, C)) * proj_std).astype(jnp.bfloat16),
            'b_attn_proj': jnp.zeros((1, C), jnp.float32),
            'ln_mlp': jnp.concatenate([jnp.ones((1, C), jnp.float32),
                                       jnp.zeros((1, C), jnp.float32)], axis=0),
            'w_fc_t': (jax.random.normal(nk(), (C, 4 * C)) * std).astype(jnp.bfloat16),
            'w_mlp_proj_t': (jax.random.normal(nk(), (4 * C, C)) * proj_std).astype(jnp.bfloat16),
            'b_mlp': jnp.zeros((1, 5 * C), jnp.float32),        # [b_fc | b_mlp_proj]
        }
        params['blocks'].append(blk)
    return params


def gpt_forward(params, idx, targets=None, *, n_head):
    B, T = idx.shape
    # embedding gather + positional add kept in plain JAX glue
    tok_emb = params['wte'][idx]                   # (B, T, C)
    pos_emb = params['wpe'][:T][None]              # (1, T, C)
    x = (tok_emb + pos_emb).astype(jnp.float32)

    tq_attn = min(T, 128)                          # flash q-tile
    tk_attn = min(T, 128)                          # flash kv-tile
    tq_row = min(T, 512 if _BIG_VMEM else 256)     # row tile for qkv/mlp kernels

    for blk in params['blocks']:
        q, k, v = run_qkv(x, blk, tq_row)
        x = run_flash_attn(x, q, k, v, blk, n_head, tq_attn, tk_attn)
        x = run_mlp(x, blk, tq_row)

    logits = run_head(x, params['ln_f'], params['wte_t'])
    loss = None
    if targets is not None:
        # TODO(synk): fuse cross-entropy (online logsumexp per V tile) into the head kernel
        # to avoid materializing f32 logits when training; kept as plain JAX glue here.
        logp = jax.nn.log_softmax(logits, axis=-1)
        loss = -jnp.mean(jnp.take_along_axis(logp, targets[..., None], axis=-1))
    return logits, loss


# ----------------------------- main -----------------------------

if __name__ == "__main__":
    vocab_size, block_size, n_layer, n_head, n_embd = 128, 16, 2, 4, 32
    B, T = 2, 8

    key = jax.random.PRNGKey(0)
    k_param, k_idx = jax.random.split(key)
    params = init_params(k_param, vocab_size, block_size, n_layer, n_head, n_embd)

    idx = jax.random.randint(k_idx, (B, T), 0, vocab_size, dtype=jnp.int32)
    targets = jnp.roll(idx, -1, axis=1)

    logits, loss = gpt_forward(params, idx, targets, n_head=n_head)
    jax.block_until_ready(logits)
    jax.block_until_ready(loss)

    assert logits.shape == (B, T, vocab_size)
    assert bool(jnp.all(jnp.isfinite(logits)))
    assert bool(jnp.isfinite(loss))
    print("KERNEL_OK")
</pallas_src>

<mosaic_0001>
module attributes {stable_mosaic.version = 11 : i64} {
  func.func @_qkv_kernel(%arg0: i32, %arg1: i32, %arg2: memref<1x8x32xf32, #tpu.memory_space<vmem>>, %arg3: memref<2x32xf32, #tpu.memory_space<vmem>>, %arg4: memref<32x96xbf16, #tpu.memory_space<vmem>>, %arg5: memref<1x96xf32, #tpu.memory_space<vmem>>, %arg6: memref<1x8x32xbf16, #tpu.memory_space<vmem>>, %arg7: memref<1x8x32xbf16, #tpu.memory_space<vmem>>, %arg8: memref<1x8x32xbf16, #tpu.memory_space<vmem>>) attributes {dimension_semantics = [#tpu.dimension_semantics<parallel>, #tpu.dimension_semantics<parallel>], iteration_bounds = array<i64: 2, 1>, scalar_prefetch = 0 : i64, scratch_operands = 0 : i64, tpu.core_type = #tpu.core_type<tc>, window_params = [{transform_indices = @transform_0, window_bounds = array<i64: 1, 8, 32>}, {pipeline_mode = #tpu.pipeline_mode<synchronous>, transform_indices = @transform_1, window_bounds = array<i64: 2, 32>}, {pipeline_mode = #tpu.pipeline_mode<synchronous>, transform_indices = @transform_2, window_bounds = array<i64: 32, 96>}, {pipeline_mode = #tpu.pipeline_mode<synchronous>, transform_indices = @transform_3, window_bounds = array<i64: 1, 96>}, {transform_indices = @transform_4, window_bounds = array<i64: 1, 8, 32>}, {transform_indices = @transform_5, window_bounds = array<i64: 1, 8, 32>}, {transform_indices = @transform_6, window_bounds = array<i64: 1, 8, 32>}]} {
    %c0 = arith.constant 0 : index
    %c0_0 = arith.constant 0 : index
    %c0_1 = arith.constant 0 : index
    %0 = vector.load %arg2[%c0, %c0_0, %c0_1] : memref<1x8x32xf32, #tpu.memory_space<vmem>>, vector<1x8x32xf32>
    %1 = vector.shape_cast %0 : vector<1x8x32xf32> to vector<8x32xf32>
    %c0_2 = arith.constant 0 : index
    %c0_3 = arith.constant 0 : index
    %2 = vector.load %arg3[%c0_2, %c0_3] : memref<2x32xf32, #tpu.memory_space<vmem>>, vector<2x32xf32>
    %3 = vector.extract_strided_slice %2 {offsets = [0, 0], sizes = [1, 32], strides = [1, 1]} : vector<2x32xf32> to vector<1x32xf32>
    %4 = vector.extract_strided_slice %2 {offsets = [1, 0], sizes = [1, 32], strides = [1, 1]} : vector<2x32xf32> to vector<1x32xf32>
    %cst = arith.constant dense<0.000000e+00> : vector<8xf32>
    %5 = vector.multi_reduction <add>, %1, %cst [1] : vector<8x32xf32> to vector<8xf32>
    %6 = vector.shape_cast %5 : vector<8xf32> to vector<8x1xf32>
    %cst_4 = arith.constant 3.200000e+01 : f32
    %7 = vector.broadcast %cst_4 : f32 to vector<8x1xf32>
    %8 = arith.divf %6, %7 : vector<8x1xf32>
    %9 = vector.broadcast %8 : vector<8x1xf32> to vector<8x32xf32>
    %10 = arith.subf %1, %9 : vector<8x32xf32>
    %11 = arith.mulf %10, %10 : vector<8x32xf32>
    %cst_5 = arith.constant dense<0.000000e+00> : vector<8xf32>
    %12 = vector.multi_reduction <add>, %11, %cst_5 [1] : vector<8x32xf32> to vector<8xf32>
    %13 = vector.shape_cast %12 : vector<8xf32> to vector<8x1xf32>
    %cst_6 = arith.constant 3.200000e+01 : f32
    %14 = vector.broadcast %cst_6 : f32 to vector<8x1xf32>
    %15 = arith.divf %13, %14 : vector<8x1xf32>
    %16 = vector.broadcast %8 : vector<8x1xf32> to vector<8x32xf32>
    %17 = arith.subf %1, %16 : vector<8x32xf32>
    %cst_7 = arith.constant 9.99999974E-6 : f32
    %18 = vector.broadcast %cst_7 : f32 to vector<8x1xf32>
    %19 = arith.addf %15, %18 : vector<8x1xf32>
    %20 = math.rsqrt %19 : vector<8x1xf32>
    %21 = vector.broadcast %20 : vector<8x1xf32> to vector<8x32xf32>
    %22 = arith.mulf %17, %21 : vector<8x32xf32>
    %23 = vector.broadcast %3 : vector<1x32xf32> to vector<8x32xf32>
    %24 = arith.mulf %22, %23 : vector<8x32xf32>
    %25 = vector.broadcast %4 : vector<1x32xf32> to vector<8x32xf32>
    %26 = arith.addf %24, %25 : vector<8x32xf32>
    %27 = arith.truncf %26 : vector<8x32xf32> to vector<8x32xbf16>
    %c0_8 = arith.constant 0 : index
    %c0_9 = arith.constant 0 : index
    %28 = vector.load %arg4[%c0_8, %c0_9] : memref<32x96xbf16, #tpu.memory_space<vmem>>, vector<32x96xbf16>
    %cst_10 = arith.constant dense<0.000000e+00> : vector<8x96xf32>
    %29 = tpu.matmul %27, %28, %cst_10 {dimension_numbers = #tpu.dot_dimension_numbers<[1], [0], [0], [1], [0, 0, 1, 1], [], []>} : vector<8x32xbf16>, vector<32x96xbf16>, vector<8x96xf32> -> vector<8x96xf32>
    %c0_11 = arith.constant 0 : index
    %c0_12 = arith.constant 0 : index
    %30 = vector.load %arg5[%c0_11, %c0_12] : memref<1x96xf32, #tpu.memory_space<vmem>>, vector<1x96xf32>
    %31 = vector.broadcast %30 : vector<1x96xf32> to vector<8x96xf32>
    %32 = arith.addf %29, %31 : vector<8x96xf32>
    %33 = arith.truncf %32 : vector<8x96xf32> to vector<8x96xbf16>
    %34 = vector.extract_strided_slice %33 {offsets = [0, 0], sizes = [8, 32], strides = [1, 1]} : vector<8x96xbf16> to vector<8x32xbf16>
    %c0_13 = arith.constant 0 : index
    %c0_14 = arith.constant 0 : index
    %c0_15 = arith.constant 0 : index
    %35 = vector.load %arg6[%c0_13, %c0_14, %c0_15] : memref<1x8x32xbf16, #tpu.memory_space<vmem>>, vector<1x8x32xbf16>
    %36 = vector.shape_cast %35 : vector<1x8x32xbf16> to vector<8x32xbf16>
    %37 = vector.shape_cast %34 : vector<8x32xbf16> to vector<1x8x32xbf16>
    tpu.vector_store %arg6[%c0_13, %c0_14, %c0_15], %37 {strides = array<i32>} : memref<1x8x32xbf16, #tpu.memory_space<vmem>>, vector<1x8x32xbf16>,
    %38 = vector.extract_strided_slice %33 {offsets = [0, 32], sizes = [8, 32], strides = [1, 1]} : vector<8x96xbf16> to vector<8x32xbf16>
    %c0_16 = arith.constant 0 : index
    %c0_17 = arith.constant 0 : index
    %c0_18 = arith.constant 0 : index
    %39 = vector.load %arg7[%c0_16, %c0_17, %c0_18] : memref<1x8x32xbf16, #tpu.memory_space<vmem>>, vector<1x8x32xbf16>
    %40 = vector.shape_cast %39 : vector<1x8x32xbf16> to vector<8x32xbf16>
    %41 = vector.shape_cast %38 : vector<8x32xbf16> to vector<1x8x32xbf16>
    tpu.vector_store %arg7[%c0_16, %c0_17, %c0_18], %41 {strides = array<i32>} : memref<1x8x32xbf16, #tpu.memory_space<vmem>>, vector<1x8x32xbf16>,
    %42 = vector.extract_strided_slice %33 {offsets = [0, 64], sizes = [8, 32], strides = [1, 1]} : vector<8x96xbf16> to vector<8x32xbf16>
    %c0_19 = arith.constant 0 : index
    %c0_20 = arith.constant 0 : index
    %c0_21 = arith.constant 0 : index
    %43 = vector.load %arg8[%c0_19, %c0_20, %c0_21] : memref<1x8x32xbf16, #tpu.memory_space<vmem>>, vector<1x8x32xbf16>
    %44 = vector.shape_cast %43 : vector<1x8x32xbf16> to vector<8x32xbf16>
    %45 = vector.shape_cast %42 : vector<8x32xbf16> to vector<1x8x32xbf16>
    tpu.vector_store %arg8[%c0_19, %c0_20, %c0_21], %45 {strides = array<i32>} : memref<1x8x32xbf16, #tpu.memory_space<vmem>>, vector<1x8x32xbf16>,
    return
  }
  func.func @transform_0(%arg0: i32, %arg1: i32) -> (i32, i32, i32) {
    %c0_i32 = arith.constant 0 : i32
    %c0_i32_0 = arith.constant 0 : i32
    return %arg0, %arg1, %c0_i32 : i32, i32, i32
  }
  func.func @transform_1(%arg0: i32, %arg1: i32) -> (i32, i32) {
    %c0_i32 = arith.constant 0 : i32
    %c0_i32_0 = arith.constant 0 : i32
    %c0_i32_1 = arith.constant 0 : i32
    return %c0_i32, %c0_i32_0 : i32, i32
  }
  func.func @transform_2(%arg0: i32, %arg1: i32) -> (i32, i32) {
    %c0_i32 = arith.constant 0 : i32
    %c0_i32_0 = arith.constant 0 : i32
    %c0_i32_1 = arith.constant 0 : i32
    return %c0_i32, %c0_i32_0 : i32, i32
  }
  func.func @transform_3(%arg0: i32, %arg1: i32) -> (i32, i32) {
    %c0_i32 = arith.constant 0 : i32
    %c0_i32_0 = arith.constant 0 : i32
    %c0_i32_1 = arith.constant 0 : i32
    return %c0_i32, %c0_i32_0 : i32, i32
  }
  func.func @transform_4(%arg0: i32, %arg1: i32) -> (i32, i32, i32) {
    %c0_i32 = arith.constant 0 : i32
    %c0_i32_0 = arith.constant 0 : i32
    return %arg0, %arg1, %c0_i32 : i32, i32, i32
  }
  func.func @transform_5(%arg0: i32, %arg1: i32) -> (i32, i32, i32) {
    %c0_i32 = arith.constant 0 : i32
    %c0_i32_0 = arith.constant 0 : i32
    return %arg0, %arg1, %c0_i32 : i32, i32, i32
  }
  func.func @transform_6(%arg0: i32, %arg1: i32) -> (i32, i32, i32) {
    %c0_i32 = arith.constant 0 : i32
    %c0_i32_0 = arith.constant 0 : i32
    return %arg0, %arg1, %c0_i32 : i32, i32, i32
  }
}

</mosaic_0001>

<bundles_post_ra>
// kernel: tpu_custom_call.1
= control target key start
LH: loop header
LB: loop body
LE: loop exit
PB: predicated region body
PF: predicated region fallthrough
CT: control target
= control target key end

     0   :  { %s1260_s0 = inlined_call_operand.hbm [shape: f32[2,8,32], index: 0, kind: input, shape index: {}]   ;;  %s1261_s1 = inlined_call_operand.hbm [shape: f32[2,32], index: 1, kind: input, shape index: {}]   ;;  %s1262_s2 = inlined_call_operand.hbm [shape: bf16[32,96], index: 2, kind: input, shape index: {}]   ;;  %s1263_s3 = inlined_call_operand.vmem [shape: f32[1,96], index: 3, kind: input, shape index: {}]   ;;  %s1264_s4 = inlined_call_operand.hbm [shape: bf16[2,8,32], index: 4, kind: output, shape index: {0}]   ;;  %s1265_s5 = inlined_call_operand.hbm [shape: bf16[2,8,32], index: 5, kind: output, shape index: {1}]   ;;  %s1266_s6 = inlined_call_operand.hbm [shape: bf16[2,8,32], index: 6, kind: output, shape index: {2}]  }
   0x1   :  { %1268 = sst [smem:[#allocation16_spill]] %s1260_s0 }
   0x2   :  { %1269 = sst [smem:[#allocation17_spill]] %s1261_s1 }
   0x3   :  { %12 = vsyncpa [#allocation3], 0 }
   0x4   :  { %14 = vsyncpa [#allocation3 + $0x1], 0 }
   0x5   :  { %15 = vsyncpa [#allocation6], 0 }
   0x6   :  { %16 = vsyncpa [#allocation4], 0 }
   0x7   :  { %18 = vsyncpa [#allocation4 + $0x1], 0 }
   0x8   :  { %19 = vsyncpa [#allocation10], 0 }
   0x9   :  { %21 = vsyncpa [#allocation10 + $0x1], 0  ;;  %s1063_s21 = smov 0   ;;  %s1065_s22 = smov 0  }
   0xa   :  { %s1067_s23 = smov 0   ;;  %s1069_s24 = smov 0  }
   0xb   :  { %s1071_s25 = smov 0   ;;  %s1073_s26 = smov 0  }
   0xc LB: > { %s1094_s27 = sadd.s32 4294967295, %s1019_s26   ;;  %s1267_s28 = sadd.s32 4294967294, %s1019_s26   ;;  %s1019_s26 = sphi %s1073_s26, %s27_s26   ;;  %s1015_s25 = sphi %s1071_s25, %s1281_s25   ;;  %s1011_s24 = sphi %s1069_s24, %s1280_s24   ;;  %s1007_s23 = sphi %s1067_s23, %s1279_s23   ;;  %s1003_s22 = sphi %s1065_s22, %s1278_s22   ;;  %s999_s21 = sphi %s1063_s21, %s1277_s21  }
   0xd   : > { %p61_p0 = scmp.ne.s32.totalorder %s1003_s22, %s999_s21  ;;  %p62_p1 = scmp.eq.s32.totalorder %s1094_s27, 0 }
   0xe   : > { %p156_p2 = scmp.eq.s32.totalorder %s1267_s28, 1  ;;  %p648_p4 = scmp.ge.s32.totalorder %s1019_s26, 1 }
   0xf   : > { %p1104_p3 = por %p62_p1, %p61_p0  ;;  %p219_p6 = scmp.lt.s32.totalorder %s1019_s26, 3 }
  0x10   : > { %p1109_p5 = por %p156_p2, %p61_p0  ;;  %s1272_s1 = sld [smem:[#allocation17_spill]] }
  0x11   : > { %p1117_p7 = pnand %p648_p4, %p219_p6  ;;  %p651_p8 = scmp.ge.s32.totalorder %s1019_s26, 2 }
  0x12   : > { %s1021_s11 = smov [#allocation5]   ;;  %s242_s15 = sshll.u32 %s1262_s2, 4  ;;  %s243_s15 = int_to_ptr.hbm [resolvable:$true] %s242_s15 }
  0x13   : > { %p696_p9 = pneg %p1117_p7  ;;  %s233_s12 = sshll.u32 %s1021_s11, 4  ;;  %s234_s12 = int_to_ptr.vmem [resolvable:$true] %s233_s12 }
  0x14   : > { %s1022_s16 = smov [#allocation7]   ;;  %s1023_s18 = smov 64  }
  0x15   : > { %p697_p10 = pnand %p696_p9, %p62_p1  ;;  %s244_s17 = sshll.u32 %s1022_s16, 4  ;;  %s245_s17 = int_to_ptr.vmem [resolvable:$true] %s244_s17 }
  0x16   : > { %s231_s9 = sshll.u32 %s1272_s1, 4  ;;  %s1024_s19 = smov 4   ;;  %s232_s9 = int_to_ptr.hbm [resolvable:$true] %s231_s9 }
  0x17   : > { %699 = dma.hbm_to_vmem [thread:$0]  (!%p697_p10), %s232_s9, 32, %s234_s12, [#allocation6]  }
  0x18   : > { %702 = dma.hbm_to_vmem [thread:$0]  (!%p697_p10), %s243_s15, 256, %s245_s17, [#allocation6], %s1023_s18, %s1023_s18, %s1024_s19  }
  0x19   : > { %p150_p11 = scmp.eq.s32.totalorder %s1094_s27, 1  ;;  %s39_s20 = sadd.s32 1, %s1015_s25 }
  0x1a   : > { %p41_p12 = scmp.ge.s32.totalorder %s39_s20, 2  ;;  %s48_s7 = sadd.s32 1, %s1007_s23 }
  0x1b   : > { %p55_p13 = scmp.ne.s32.totalorder %s1007_s23, %s1003_s22  ;;  %p56_p0 = scmp.eq.s32.totalorder %s1019_s26, 0 }
  0x1c   : > { %s1283_s20 = smov (%p41_p12, %s39_s20), 0  ;;  %p719_p4 = scmp.lt.s32.totalorder %s1019_s26, 2 }
  0x1d   : > { %p1137_p2 = por %p150_p11, %p55_p13  ;;  %s43_s9 = ssub.s32 %s1015_s25, %s1283_s20 }
  0x1e   : > { %s261_s11 = sand.u32 1, %s1007_s23   ;;  %p46_p6 = scmp.eq.s32.totalorder %s43_s9, 0 }
  0x1f   : > { %p57_p9 = por %p56_p0, %p55_p13  ;;  %s652_s12 = sshll.u32 %s261_s11, 3 }
  0x20   : > { %s653_s13 = sshll.u32 %s1015_s25, 3  ;;  %s1275_s0 = sld [smem:[#allocation16_spill]] }
  0x21   : > { %s1147_s14 = scalar_select %p46_p6, %s1007_s23, %s48_s7  }
  0x22   : > { %s265_s19 = scalar_lea.vmem [#allocation2], %s652_s12  ;;  %p704_p10 = pnand %p719_p4, %p57_p9 }
  0x23   : > { %s274_s28 = sshll.u32 %s265_s19, 4  ;;  %s262_s1 = scalar_lea.sflag [#allocation3], %s261_s11  ;;  %s275_s28 = int_to_ptr.vmem [resolvable:$true] %s274_s28 }
  0x24   : > { %283 = sbr.rel (%p1117_p7) target bundleno = 576 (0x240), region = 36  ;;  %s1157_s7 = sand.u32 (!%p1117_p7), 1, %s1003_s22  }
  0x25   : > { %s655_s9 = sshll.u32 (!%p1117_p7), %s1157_s7, 3 }
  0x26   : > { %s270_s17 = scalar_lea.hbm %s1275_s0, %s653_s13  ;;  %s286_s13 = scalar_lea.sflag (!%p1117_p7), [#allocation3], %s1157_s7 }
  0x27   : > { %s272_s18 = sshll.u32 %s270_s17, 4  ;;  %s289_s15 = scalar_lea.vmem (!%p1117_p7), [#allocation2], %s655_s9  ;;  %s273_s18 = int_to_ptr.hbm [resolvable:$true] %s272_s18 }
  0x28   : > { %706 = dma.hbm_to_vmem [thread:$0]  (!%p704_p10), %s273_s18, 128, %s275_s28, %s262_s1  }
  0x29   : > { %982 = dma.done.wait (%p1104_p3), %s286_s13, 128  }
  0x2a   : > { %984 = vsyncadd (%p1104_p3), %s286_s13, 4294967168 }
  0x2b   : > { %986 = dma.done.wait (%p62_p1), [#allocation6], 288  }
  0x2c   : > { %988 = vsyncadd (%p62_p1), [#allocation6], 4294967008  ;;  %vm342_vm0 = vcmask 261120   ;;  %v340_v0 = vld [vmem:[%s289_s15] sm:$0xff]  ;;  %v1025_v2 = vmov 32.0   ;;  %v678_v15 = vld [vmem:[#allocation7] sm:$0xff] }
  0x2d   : > { %v343_v1 = vsel %vm342_vm0, %v340_v0, 0.0  ;;  %779 = vrcp.f32 %v1025_v2  ;;  %v679_v14 = vld [vmem:[#allocation7 + $0x8] sm:$0xff]  ;;  %v341_v24 = vld [vmem:[#allocation5] sm:$0x3]  ;;  %s1176_s29 = sshll.u32 %s1157_s7, 2  ;;  %s1179_s10 = sshll.u32 %s1011_s24, 2 }
  0x2e   : > { %344 = vadd.xlane.f32.xlu0 %v343_v1  ;;  %406 = vmatpush.bf16.msra.mxu0 %v679_v14  ;;  %v372_v26 = vperm.slane %v341_v24, 0  ;;  %v374_v29 = vperm.slane %v341_v24, 1  ;;  %v778_v33 = vld [vmem:[%s1263_s3] ss:$0 sm:$0xff]  ;;  %s447_s16 = scalar_lea.hbm %s1264_s4, %s1179_s10  ;;  %vm414_vm5 = vcmask 257024   ;;  %s324_s17 = scalar_lea.vmem [#allocation8], %s1176_s29 }
  0x2f   : > { %s449_s18 = sshll.u32 %s324_s17, 4  ;;  %s451_s19 = sshll.u32 %s447_s16, 4  ;;  %s450_s18 = int_to_ptr.vmem [resolvable:$true] %s449_s18  ;;  %s452_s19 = int_to_ptr.hbm [resolvable:$true] %s451_s19 }
  0x30   : > { %s1026_s9 = smov 96   ;;  %s426_s24 = scalar_lea.sflag [#allocation4], %s1157_s7 }
  0x31   : > { %s887_s13 = sshra.s32 %s452_s19, 4  ;;  %s893_s11 = scalar_lea.hbm %s1264_s4, 8  ;;  %s888_s13 = int_to_ptr.hbm [resolvable:$true] %s887_s13 }
  0x32   : > { %407 = vmatpush.bf16.msra.mxu0 %v678_v15  ;;  %s889_s15 = scalar_lea.hbm %s888_s13, 4  ;;  %p894_p11 = scmp.lt.s32.totalorder %s888_s13, %s1264_s4 }
  0x33   : > { %v780_v3 = vpop.eup %779  ;;  %p890_p1 = scmp.ne.s32.totalorder %s888_s13, %s889_s15  ;;  %p895_p12 = scmp.lt.s32.totalorder %s893_s11, %s889_s15 }
  0x34   : > { %v347_v4 = vmul.f32 32.0, %v780_v3  ;;  %vm351_vm1 = vweird.f32 %v780_v3 }
  0x35   : > { %p891_p3 = pnand %p890_p1, %p1137_p2  ;;  %p896_p13 = por %p895_p12, %p894_p11 }
  0x36   : > { %v348_v5 = vsub.f32 1.0, %v347_v4 }
  0x37   : > { %p892_p7 = pneg %p891_p3 }
  0x38   : > { %v349_v6 = vmul.f32 %v780_v3, %v348_v5 }
  0x39   : > { %p897_p0 = pnand %p896_p13, %p892_p7 }
  0x3a   : > { %v350_v7 = vadd.f32 %v780_v3, %v349_v6 }
  0x3c   : > { %v352_v8 = vsel %vm351_vm1, %v780_v3, %v350_v7 }
  0xa1   : > { %v345_v9 = vpop.xlane.xlu0 %344 }
  0xa2   : > { %v353_v10 = vmul.f32 %v352_v8, %v345_v9 }
  0xa4   : > { %v354_v11 = vsub.f32 %v340_v0, %v353_v10 }
  0xa6   : > { %v355_v12 = vmul.f32 %v354_v11, %v354_v11 }
  0xa8   : > { %v356_v13 = vsel %vm342_vm0, %v355_v12, 0.0 }
  0xa9   : > { %357 = vadd.xlane.f32.xlu0 %v356_v13 }
 0x11c   : > { %v358_v16 = vpop.xlane.xlu0 %357 }
 0x11d   : > { %v359_v17 = vmul.f32 %v358_v16, %v352_v8 }
 0x11f   : > { %v360_v18 = vadd.f32 1e-05, %v359_v17 }
 0x121   : > { %781 = vrsqrt.f32 %v360_v18  ;;  %vm367_vm3 = vweird.f32 %v360_v18 }
 0x127   : > { %v782_v19 = vpop.eup %781 }
 0x128   : > { %v362_v20 = vmul.f32 %v782_v19, %v360_v18  ;;  %vm368_vm2 = vweird.f32 %v782_v19 }
 0x129   : > { %vm369_vm4 = vmor %vm367_vm3, %vm368_vm2 }
 0x12a   : > { %v363_v21 = vmul.f32 %v782_v19, %v362_v20 }
 0x12c   : > { %v364_v22 = vmul.f32 0.5, %v363_v21 }
 0x12e   : > { %v365_v23 = vsub.f32 1.5, %v364_v22 }
 0x130   : > { %v366_v25 = vmul.f32 %v782_v19, %v365_v23 }
 0x132   : > { %v370_v27 = vsel %vm369_vm4, %v782_v19, %v366_v25 }
 0x133   : > { %v371_v28 = vmul.f32 %v370_v27, %v354_v11 }
 0x135   : > { %v373_v30 = vmul.f32 %v372_v26, %v371_v28 }
 0x137   : > { %v375_v31 = vadd.f32 %v374_v29, %v373_v30 }
 0x139   : > { %v376_v32 = vpack.c.bf16 %v375_v31, %v375_v31 }
 0x13b   : > { %669 = vmatmul.msk.bf16.vlgmr.msra.gmra.mxu0 %vm342_vm0, %v376_v32 }
 0x1b8   : > { %v409_v34 = vpop.f32.mrf.mxu0 }
 0x1b9   : > { %v410_v35 = vadd.f32 %v778_v33, %v409_v34 }
 0x1bb   : > { %v413_v36 = vpack.c.bf16 %v410_v35, %v410_v35 }
 0x1bd   : > { %417 = vrot.lane.b32.xlu1 %v413_v36, %s1026_s9  ;;  %415 = vst.msk [vmem:[%s324_s17] sm:$0xf] %vm414_vm5, %v413_v36 }
 0x1be   : > { %900 = shalt.err (!%p897_p0)
}
 0x1bf   : > { %690 = dma.vmem_to_hbm [thread:$0]  (%p1137_p2), %s450_s18, 64, %s452_s19, %s426_s24  }
 0x1c0   : > { %v411_v37 = vpop.f32.mrf.mxu0  ;;  %s1027_s7 = smov 64   ;;  %s462_s1 = scalar_lea.hbm %s1265_s5, %s1179_s10 }
 0x1c1   : > { %s430_s13 = sand.u32 1, %s1094_s27   ;;  %s331_s15 = scalar_lea.vmem [#allocation9], %s1176_s29 }
 0x1c2   : > { %s464_s28 = sshll.u32 %s331_s15, 4  ;;  %s466_s11 = sshll.u32 %s462_s1, 4  ;;  %s465_s28 = int_to_ptr.vmem [resolvable:$true] %s464_s28  ;;  %s467_s11 = int_to_ptr.hbm [resolvable:$true] %s466_s11 }
 0x1c3   : > { %s477_s18 = scalar_lea.hbm %s1266_s6, %s1179_s10  ;;  %s1209_s19 = scalar_lea.sflag [#allocation10], %s430_s13 }
 0x1c4   : > { %s915_s24 = sshra.s32 %s467_s11, 4  ;;  %s921_s9 = scalar_lea.hbm %s1265_s5, 8  ;;  %s916_s24 = int_to_ptr.hbm [resolvable:$true] %s915_s24 }
 0x1c5   : > { %421 = vrot.lane.b32.xlu1 %v413_v36, %s1027_s7  ;;  %s917_s7 = scalar_lea.hbm %s916_s24, 4  ;;  %p922_p10 = scmp.lt.s32.totalorder %s916_s24, %s1265_s5 }
 0x1c6   : > { %p918_p4 = scmp.ne.s32.totalorder %s916_s24, %s917_s7  ;;  %p923_p1 = scmp.lt.s32.totalorder %s921_s9, %s917_s7 }
 0x1c8   : > { %p919_p6 = pnand %p918_p4, %p1137_p2  ;;  %p924_p3 = por %p923_p1, %p922_p10 }
 0x1ca   : > { %p920_p9 = pneg %p919_p6 }
 0x1cc   : > { %p925_p7 = pnand %p924_p3, %p920_p9 }
 0x22f   : > { %v418_v38 = vpop.permute.xlu1 %417 }
 0x230   : > { %420 = vst.msk [vmem:[%s331_s15] sm:$0xf] %vm414_vm5, %v418_v38 }
 0x231   : > { %928 = shalt.err (!%p925_p7)
}
 0x232   : > { %691 = dma.vmem_to_hbm [thread:$0]  (%p1137_p2), %s465_s28, 64, %s467_s11, %s1209_s19  }
 0x233   : > { %s338_s10 = scalar_lea.vmem [#allocation11], %s1176_s29  ;;  %s481_s15 = sshll.u32 %s477_s18, 4  ;;  %s482_s15 = int_to_ptr.hbm [resolvable:$true] %s481_s15 }
 0x234   : > { %s479_s13 = sshll.u32 %s338_s10, 4  ;;  %s943_s0 = sshra.s32 %s482_s15, 4  ;;  %s480_s13 = int_to_ptr.vmem [resolvable:$true] %s479_s13  ;;  %s944_s0 = int_to_ptr.hbm [resolvable:$true] %s943_s0 }
 0x235   : > { %s945_s12 = scalar_lea.hbm %s944_s0, 4  ;;  %s949_s7 = scalar_lea.hbm %s1266_s6, 8 }
 0x236   : > { %p946_p11 = scmp.ne.s32.totalorder %s944_s0, %s945_s12  ;;  %p950_p0 = scmp.lt.s32.totalorder %s944_s0, %s1266_s6 }
 0x237   : > { %v422_v39 = vpop.permute.xlu1 %421  ;;  %p951_p4 = scmp.lt.s32.totalorder %s949_s7, %s945_s12 }
 0x238   : > { %424 = vst.msk [vmem:[%s338_s10] sm:$0xf] %vm414_vm5, %v422_v39  ;;  %p947_p12 = pnand %p946_p11, %p1137_p2 }
 0x239   : > { %p952_p6 = por %p951_p4, %p950_p0 }
 0x23a   : > { %p948_p13 = pneg %p947_p12 }
 0x23c   : > { %p953_p9 = pnand %p952_p6, %p948_p13 }
 0x23e   : > { %956 = shalt.err (!%p953_p9)
}
 0x23f   : > { %692 = dma.vmem_to_hbm [thread:$0]  (%p1137_p2), %s480_s13, 64, %s482_s15, %s1209_s19  }
 0x240 PF: > { %s493_s11 = sand.u32 1, %s999_s21   ;;  %p708_p10 = pnand %p651_p8, %p1109_p5 }
 0x241   : > { %s494_s18 = scalar_lea.sflag [#allocation4], %s493_s11 }
 0x242   : > { %p709_p1 = pneg %p708_p10 }
 0x244   : > { %990 = dma.done.wait (%p709_p1), %s494_s18, 64  }
 0x245   : > { %992 = vsyncadd (%p709_p1), %s494_s18, 4294967232  ;;  %s1276_s27 = sadd.s32 4294967294, %s1019_s26  }
 0x246   : > { %s503_s17 = sand.u32 1, %s1276_s27  }
 0x247   : > { %s504_s9 = scalar_lea.sflag [#allocation10], %s503_s17 }
 0x248   : > { %994 = dma.done.wait (%p709_p1), %s504_s9, 128  }
 0x249   : > { %996 = vsyncadd (%p709_p1), %s504_s9, 4294967168  ;;  %s27_s26 = sadd.s32 1, %s1019_s26   ;;  %s1277_s21 = smov %s1003_s22 }
 0x24a   : > { %p24_p2 = scmp.ge.s32.totalorder %s27_s26, 4   ;;  %s1278_s22 = smov %s1007_s23 }
 0x24b   : > { %s1279_s23 = smov %s1147_s14  ;;  %s1280_s24 = smov %s1015_s25 }
 0x24c   : > { %s1281_s25 = smov %s1283_s20  ;;  %26 = sbr.rel (!%p24_p2) target bundleno = 12 (0xc), region = 121 }
 0x251   :  { %520 = vsyncpa [#allocation3], 1 }
 0x252   :  { %522 = vsyncpa [#allocation3 + $0x1], 1 }
 0x253   :  { %523 = vsyncpa [#allocation6], 1 }
 0x254   :  { %524 = vsyncpa [#allocation4], 1 }
 0x255   :  { %526 = vsyncpa [#allocation4 + $0x1], 1 }
 0x256   :  { %527 = vsyncpa [#allocation10], 1 }
 0x257   :  { %529 = vsyncpa [#allocation10 + $0x1], 1 }

</bundles_post_ra>
